<compile_context>
chip_gen: v5e
topology: v5e:2x2
jax: 0.10.0
libtpu: 0.0.40
codegen_flags: <defaults>
</compile_context>

<pallas_src>
import jax
import jax.numpy as jnp
from jax import lax
from jax.experimental import pallas as pl
from jax.experimental.pallas import tpu as pltpu  # noqa: F401  (TPU backend)


def _wn_linear_kernel(x_ref, v_ref, g_ref, b_ref, o_ref):
    x = x_ref[...]
    v = v_ref[...]

    # MXU: x [B, IN] contracted with v [OUT, IN] over IN -> [B, OUT],
    # f32 accumulation. No w = g*v/||v|| tile, no v transpose.
    xv = lax.dot_general(
        x, v,
        dimension_numbers=(((1,), (1,)), ((), ())),
        preferred_element_type=jnp.float32)                       # [B, OUT]

    # Per-output-row sum of squares, produced directly as a lane-major row:
    # ones[1, IN] . (v*v)[OUT, IN] (contract IN) -> [1, OUT]. Avoids an
    # [OUT, 1] column result and the cross-lane relayout/transpose it needs.
    v32 = v.astype(jnp.float32)
    ones_row = jnp.ones((1, v32.shape[1]), jnp.float32)
    sumsq = lax.dot_general(
        ones_row, v32 * v32,
        dimension_numbers=(((1,), (1,)), ((), ())),
        preferred_element_type=jnp.float32)                       # [1, OUT]

    # EUP rsqrt instead of sqrt + broadcast divide. An all-zero row of v
    # yields inf/NaN here, matching the PyTorch reference behavior.
    scale = g_ref[...].astype(jnp.float32) * lax.rsqrt(sumsq)     # [1, OUT]

    o_ref[...] = (xv * scale + b_ref[...].astype(jnp.float32)).astype(o_ref.dtype)


def weight_norm_linear(x, weight_v, weight_g, bias):
    """x: [B, IN], weight_v: [OUT, IN], weight_g: [OUT, 1], bias: [OUT]."""
    B, IN = x.shape
    OUT = weight_v.shape[0]
    # Lane-major [1, OUT] layouts for the per-output-column scale and bias so
    # they broadcast down sublanes for free inside the kernel.
    g_row = weight_g.reshape(1, OUT)
    b_row = bias.reshape(1, OUT)
    return pl.pallas_call(
        _wn_linear_kernel,
        out_shape=jax.ShapeDtypeStruct((B, OUT), x.dtype),
        in_specs=[
            pl.BlockSpec((B, IN), lambda: (0, 0)),
            pl.BlockSpec((OUT, IN), lambda: (0, 0)),
            pl.BlockSpec((1, OUT), lambda: (0, 0)),
            pl.BlockSpec((1, OUT), lambda: (0, 0)),
        ],
        out_specs=pl.BlockSpec((B, OUT), lambda: (0, 0)),
    )(x, weight_v, g_row, b_row)


def _norm_except_dim_0(w):
    # mirrors WeightNormLayer.norm_except_dim_0 for parameter init
    flat = w.reshape(w.shape[0], -1)
    out = jnp.sqrt(jnp.sum(flat * flat, axis=1))
    return out.reshape((w.shape[0],) + (1,) * (w.ndim - 1))


def _reference(x, weight_v, weight_g, bias):
    w = weight_g * weight_v / _norm_except_dim_0(weight_v)
    return x @ w.T + bias[None, :]


if __name__ == "__main__":
    # Wrapped module: nn.Linear(in_features=32, out_features=32)
    B, IN, OUT = 8, 32, 32
    key = jax.random.PRNGKey(0)
    kx, kw, kb = jax.random.split(key, 3)

    x = jax.random.normal(kx, (B, IN), dtype=jnp.float32)
    # deterministic "weight" of the wrapped Linear
    weight = jax.random.normal(kw, (OUT, IN), dtype=jnp.float32) * 0.1
    bias = jax.random.normal(kb, (OUT,), dtype=jnp.float32) * 0.01

    # __init__ of WeightNormLayer: weight_g = ||weight||, weight_v = weight
    weight_g = _norm_except_dim_0(weight)           # [OUT, 1]
    weight_v = weight                               # [OUT, IN]

    y = weight_norm_linear(x, weight_v, weight_g, bias)
    y = jax.block_until_ready(y)

    y_ref = _reference(x, weight_v, weight_g, bias)
    assert jnp.allclose(y, y_ref, atol=1e-5, rtol=1e-5), "mismatch vs reference"

    print("KERNEL_OK")
</pallas_src>

<mosaic_0001>
module attributes {stable_mosaic.version = 11 : i64} {
  func.func @_wn_linear_kernel(%arg0: memref<8x32xf32, #tpu.memory_space<vmem>>, %arg1: memref<32x32xf32, #tpu.memory_space<vmem>>, %arg2: memref<1x32xf32, #tpu.memory_space<vmem>>, %arg3: memref<1x32xf32, #tpu.memory_space<vmem>>, %arg4: memref<8x32xf32, #tpu.memory_space<vmem>>) attributes {dimension_semantics = [], scalar_prefetch = 0 : i64, scratch_operands = 0 : i64, tpu.core_type = #tpu.core_type<tc>} {
    %c0 = arith.constant 0 : index
    %c0_0 = arith.constant 0 : index
    %0 = vector.load %arg0[%c0, %c0_0] : memref<8x32xf32, #tpu.memory_space<vmem>>, vector<8x32xf32>
    %c0_1 = arith.constant 0 : index
    %c0_2 = arith.constant 0 : index
    %1 = vector.load %arg1[%c0_1, %c0_2] : memref<32x32xf32, #tpu.memory_space<vmem>>, vector<32x32xf32>
    %cst = arith.constant dense<0.000000e+00> : vector<8x32xf32>
    %2 = tpu.matmul %0, %1, %cst {dimension_numbers = #tpu.dot_dimension_numbers<[1], [1], [0], [0], [0, 0, 1, 0], [], []>} : vector<8x32xf32>, vector<32x32xf32>, vector<8x32xf32> -> vector<8x32xf32>
    %cst_3 = arith.constant 1.000000e+00 : f32
    %3 = vector.broadcast %cst_3 : f32 to vector<1x32xf32>
    %4 = arith.mulf %1, %1 : vector<32x32xf32>
    %cst_4 = arith.constant dense<0.000000e+00> : vector<1x32xf32>
    %5 = tpu.matmul %3, %4, %cst_4 {dimension_numbers = #tpu.dot_dimension_numbers<[1], [1], [0], [0], [0, 0, 1, 0], [], []>} : vector<1x32xf32>, vector<32x32xf32>, vector<1x32xf32> -> vector<1x32xf32>
    %c0_5 = arith.constant 0 : index
    %c0_6 = arith.constant 0 : index
    %6 = vector.load %arg2[%c0_5, %c0_6] : memref<1x32xf32, #tpu.memory_space<vmem>>, vector<1x32xf32>
    %7 = math.rsqrt %5 : vector<1x32xf32>
    %8 = arith.mulf %6, %7 : vector<1x32xf32>
    %9 = vector.broadcast %8 : vector<1x32xf32> to vector<8x32xf32>
    %10 = arith.mulf %2, %9 : vector<8x32xf32>
    %c0_7 = arith.constant 0 : index
    %c0_8 = arith.constant 0 : index
    %11 = vector.load %arg3[%c0_7, %c0_8] : memref<1x32xf32, #tpu.memory_space<vmem>>, vector<1x32xf32>
    %12 = vector.broadcast %11 : vector<1x32xf32> to vector<8x32xf32>
    %13 = arith.addf %10, %12 : vector<8x32xf32>
    %c0_9 = arith.constant 0 : index
    %c0_10 = arith.constant 0 : index
    %14 = vector.load %arg4[%c0_9, %c0_10] : memref<8x32xf32, #tpu.memory_space<vmem>>, vector<8x32xf32>
    tpu.vector_store %arg4[%c0_9, %c0_10], %13 {strides = array<i32>} : memref<8x32xf32, #tpu.memory_space<vmem>>, vector<8x32xf32>,
    return
  }
}

</mosaic_0001>

<bundles_post_ra>
// kernel: tpu_custom_call.1
= control target key start
LH: loop header
LB: loop body
LE: loop exit
PB: predicated region body
PF: predicated region fallthrough
CT: control target
= control target key end

     0   :  { %9 = vsyncpa [#allocation3], 0  ;;  %s322_s0 = inlined_call_operand.hbm [shape: f32[8,32], index: 0, kind: input, shape index: {}]   ;;  %s323_s1 = inlined_call_operand.hbm [shape: f32[32,32], index: 1, kind: input, shape index: {}]   ;;  %s324_s2 = inlined_call_operand.vmem [shape: f32[1,32], index: 2, kind: input, shape index: {}]   ;;  %s325_s3 = inlined_call_operand.vmem [shape: f32[1,32], index: 3, kind: input, shape index: {}]   ;;  %s326_s4 = inlined_call_operand.hbm [shape: f32[8,32], index: 4, kind: output, shape index: {}]  }
   0x1   :  { %10 = vsyncpa [#allocation6], 0 }
   0x2   :  { %11 = vsyncpa [#allocation4], 0  ;;  %s17_s17 = sshll.u32 %s322_s0, 4  ;;  %s265_s18 = smov [#allocation2]   ;;  %s18_s17 = int_to_ptr.hbm [resolvable:$true] %s17_s17 }
   0x3   :  { %s19_s19 = sshll.u32 %s265_s18, 4  ;;  %s27_s22 = sshll.u32 %s323_s1, 4  ;;  %s20_s19 = int_to_ptr.vmem [resolvable:$true] %s19_s19  ;;  %s28_s22 = int_to_ptr.hbm [resolvable:$true] %s27_s22 }
   0x4   :  { %22 = dma.hbm_to_vmem [thread:$0]  %s18_s17, 128, %s20_s19, [#allocation3]  }
   0x5   :  { %s266_s23 = smov [#allocation5]   ;;  %s267_s25 = smov 128  }
   0x6   :  { %s29_s24 = sshll.u32 %s266_s23, 4  ;;  %s268_s26 = smov 8   ;;  %s30_s24 = int_to_ptr.vmem [resolvable:$true] %s29_s24 }
   0x7   :  { %35 = dma.hbm_to_vmem [thread:$0]  %s28_s22, 512, %s30_s24, [#allocation6], %s267_s25, %s267_s25, %s268_s26  }
   0x8   :  { %259 = dma.done.wait [#allocation3], 128  }
   0x9   :  { %260 = vsyncadd [#allocation3], 4294967168 }
   0xa   :  { %261 = dma.done.wait [#allocation6], 512  }
   0xb   :  { %262 = vsyncadd [#allocation6], 4294966784  ;;  %v52_v0 = vld [vmem:[#allocation5 + $0x18] sm:$0xff]  ;;  %vm53_vm0 = vcmask 261120   ;;  %v51_v1 = vld [vmem:[#allocation5 + $0x10] sm:$0xff]  ;;  %v269_v9 = vmov 1.0  }
   0xc   :  { %v92_v2 = vmul.f32 %v52_v0, %v52_v0  ;;  %168 = vmatpush.xpose.msk.msra.mxu0 %vm53_vm0, %v52_v0  ;;  %v91_v3 = vmul.f32 %v51_v1, %v51_v1  ;;  %v50_v4 = vld [vmem:[#allocation5 + $0x8] sm:$0xff]  ;;  %v49_v6 = vld [vmem:[#allocation5] sm:$0xff]  ;;  %v48_v8 = vld [vmem:[#allocation2] sm:$0xff]  ;;  %s270_s29 = smov [#allocation7]   ;;  %s157_s7 = sshll.u32 %s326_s4, 4  ;;  %s158_s7 = int_to_ptr.hbm [resolvable:$true] %s157_s7 }
   0xd   :  { %v90_v5 = vmul.f32 %v50_v4, %v50_v4  ;;  %v89_v7 = vmul.f32 %v49_v6, %v49_v6  ;;  %v128_v17 = vld [vmem:[%s324_s2] sm:$0x1]  ;;  %s155_s30 = sshll.u32 %s270_s29, 4  ;;  %s156_s30 = int_to_ptr.vmem [resolvable:$true] %s155_s30 }
   0xe   :  { %173 = vmatpush.xpose.msk.msra.mxu1 %vm53_vm0, %v92_v2  ;;  %v184_v22 = vld [vmem:[%s325_s3] ss:$0 sm:$0xff] }
  0x10   :  { %169 = vmatpush.xpose.msk.msra.mxu0 %vm53_vm0, %v51_v1 }
  0x12   :  { %174 = vmatpush.xpose.msk.msra.mxu1 %vm53_vm0, %v91_v3 }
  0x14   :  { %170 = vmatpush.xpose.msk.msra.mxu0 %vm53_vm0, %v50_v4 }
  0x16   :  { %175 = vmatpush.xpose.msk.msra.mxu1 %vm53_vm0, %v90_v5 }
  0x18   :  { %171 = vmatpush.xpose.msk.msra.mxu0 %vm53_vm0, %v49_v6 }
  0x1a   :  { %176 = vmatpush.xpose.msk.msra.mxu1 %vm53_vm0, %v89_v7 }
  0x1b   :  { %172 = vmatmul.msk.f32.vlgmr.msra.gmra.mxu0 %vm53_vm0, %v48_v8 }
  0x1d   :  { %177 = vmatmul.msk.f32.vlgmr.msra.gmra.mxu1 %vm53_vm0, %v269_v9 }
  0x98   :  { %v86_v20 = vpop.f32.mrf.mxu0 }
  0x9a   :  { %v125_v10 = vpop.f32.mrf.mxu1 }
  0x9b   :  { %185 = vrsqrt.f32 %v125_v10  ;;  %vm135_vm2 = vweird.f32 %v125_v10 }
  0xa1   :  { %v186_v11 = vpop.eup %185 }
  0xa2   :  { %v130_v12 = vmul.f32 %v186_v11, %v125_v10  ;;  %vm136_vm1 = vweird.f32 %v186_v11 }
  0xa3   :  { %vm137_vm3 = vmor %vm135_vm2, %vm136_vm1 }
  0xa4   :  { %v131_v13 = vmul.f32 %v186_v11, %v130_v12 }
  0xa6   :  { %v132_v14 = vmul.f32 0.5, %v131_v13 }
  0xa8   :  { %v133_v15 = vsub.f32 1.5, %v132_v14 }
  0xaa   :  { %v134_v16 = vmul.f32 %v186_v11, %v133_v15 }
  0xac   :  { %v138_v18 = vsel %vm137_vm3, %v186_v11, %v134_v16 }
  0xad   :  { %v139_v19 = vmul.f32 %v138_v18, %v128_v17 }
  0xaf   :  { %v141_v21 = vperm.slane %v139_v19, 0 }
  0xb1   :  { %v143_v23 = vmul.f32 %v141_v21, %v86_v20 }
  0xb3   :  { %v148_v24 = vadd.f32 %v184_v22, %v143_v23 }
  0xb5   :  { %149 = vst.msk [vmem:[#allocation7] sm:$0xff] %vm53_vm0, %v148_v24 }
  0xb6   :  { %160 = dma.vmem_to_hbm [thread:$0]  %s156_s30, 128, %s158_s7, [#allocation4]  }
  0xb7   :  { %263 = dma.done.wait [#allocation4], 128  }
  0xb8   :  { %264 = vsyncadd [#allocation4], 4294967168 }
  0xb9   :  { %165 = vsyncpa [#allocation3], 1 }
  0xba   :  { %166 = vsyncpa [#allocation6], 1 }
  0xbb   :  { %167 = vsyncpa [#allocation4], 1 }

</bundles_post_ra>
